<compile_context>
chip_gen: v6e
topology: v6e:2x2x1
jax: 0.10.0
libtpu: 0.0.40
codegen_flags: <defaults>
</compile_context>

<pallas_src>
import jax
import jax.numpy as jnp
from jax.experimental import pallas as pl
from jax.experimental.pallas import tpu as pltpu


def _locked_mask(seed, bh, keep, dtype):
    """One (1, B*H) mask: bernoulli(keep) scaled by 1/keep, in x's dtype."""
    key = jax.random.PRNGKey(seed)
    bern = jax.random.bernoulli(key, p=keep, shape=(1, bh))
    return bern.astype(dtype) * jnp.asarray(1.0 / keep, dtype=dtype)


def _pick_row_tile(n_rows, row_bytes, target_bytes=2 * 1024 * 1024):
    """Largest sublane-aligned seq tile that divides T and fits the budget."""
    max_rows = max(8, target_bytes // max(1, row_bytes))
    for cand in (1024, 512, 256, 128, 64, 32, 16, 8):
        if cand <= n_rows and n_rows % cand == 0 and cand <= max_rows:
            return cand
    # Fallback: whole array as one block (valid because block dim == full dim).
    return n_rows


def _locked_dropout_kernel(x_ref, m_ref, o_ref):
    # (tT, B*H) tile times the resident (1, B*H) locked mask.  Pure VPU work,
    # fully hidden under the HBM DMA stream.
    o_ref[...] = x_ref[...] * m_ref[...]


def locked_dropout(x, seed, dropout=0.5, training=True):
    """Locked (variational) dropout.

    x:        (T, B, H) array
    seed:     python int seeding the mask RNG
    dropout:  drop probability p
    training: if False (or dropout == 0) this is the identity, matching the
              PyTorch `if not self.training or not dropout: return x` branch.
    """
    if (not training) or dropout == 0.0:
        return x

    T, B, H = x.shape
    keep = 1.0 - float(dropout)
    BH = B * H

    # Lane-dense 2D view: last dim B*H maps onto the 128-lane axis.
    x2d = x.reshape(T, BH)
    mask = _locked_mask(seed, BH, keep, x.dtype)

    row_bytes = BH * x2d.dtype.itemsize
    t_tile = _pick_row_tile(T, row_bytes)
    grid = (T // t_tile,)

    out2d = pl.pallas_call(
        _locked_dropout_kernel,
        out_shape=jax.ShapeDtypeStruct((T, BH), x.dtype),
        grid_spec=pl.GridSpec(
            grid=grid,
            in_specs=[
                pl.BlockSpec((t_tile, BH), lambda i: (i, 0)),
                pl.BlockSpec((1, BH), lambda i: (0, 0)),  # same mask every step
            ],
            out_specs=pl.BlockSpec((t_tile, BH), lambda i: (i, 0)),
        ),
        compiler_params=pltpu.CompilerParams(
            dimension_semantics=("parallel",),  # tiles independent -> megacore OK
        ),
    )(x2d, mask)
    return out2d.reshape(T, B, H)


if __name__ == "__main__":
    # Small shapes implied by the RNN usage: seq=8, batch=2, hidden=32.
    T, B, H = 8, 2, 32
    dropout = 0.5
    seed = 1234

    key = jax.random.PRNGKey(0)
    x = jax.random.normal(key, (T, B, H), dtype=jnp.float32)

    # Training-mode forward (dropout active).
    y = jax.block_until_ready(
        locked_dropout(x, seed=seed, dropout=dropout, training=True)
    )

    # Reference check: output must equal x * (locked mask broadcast over seq).
    keep = 1.0 - dropout
    mask = _locked_mask(seed, B * H, keep, x.dtype)            # (1, B*H)
    expected = (x.reshape(T, B * H) * mask).reshape(T, B, H)
    assert jnp.allclose(y, expected), "output != locked mask * x"

    # Locked-dropout semantics: kept positions are x/keep, dropped are 0,
    # and the keep/drop pattern is identical for every timestep.
    kept = jnp.broadcast_to((mask.reshape(1, B, H) != 0), x.shape)
    vals_ok = jnp.all(jnp.where(kept, jnp.isclose(y, x / keep), y == 0))
    assert bool(vals_ok), "kept values not scaled by 1/(1-p) or drops nonzero"

    # Eval-mode forward is the identity.
    y_eval = locked_dropout(x, seed=seed, dropout=dropout, training=False)
    assert jnp.array_equal(jax.block_until_ready(y_eval), x)

    print("KERNEL_OK")
</pallas_src>

<mosaic_0001>
module attributes {stable_mosaic.version = 11 : i64} {
  func.func @_locked_dropout_kernel(%arg0: i32, %arg1: memref<8x64xf32, #tpu.memory_space<vmem>>, %arg2: memref<1x64xf32, #tpu.memory_space<vmem>>, %arg3: memref<8x64xf32, #tpu.memory_space<vmem>>) attributes {dimension_semantics = [#tpu.dimension_semantics<parallel>], iteration_bounds = array<i64: 1>, scalar_prefetch = 0 : i64, scratch_operands = 0 : i64, tpu.core_type = #tpu.core_type<tc>, window_params = [{transform_indices = @transform_0, window_bounds = array<i64: 8, 64>}, {pipeline_mode = #tpu.pipeline_mode<synchronous>, transform_indices = @transform_1, window_bounds = array<i64: 1, 64>}, {transform_indices = @transform_2, window_bounds = array<i64: 8, 64>}]} {
    %c0 = arith.constant 0 : index
    %c0_0 = arith.constant 0 : index
    %0 = vector.load %arg1[%c0, %c0_0] : memref<8x64xf32, #tpu.memory_space<vmem>>, vector<8x64xf32>
    %c0_1 = arith.constant 0 : index
    %c0_2 = arith.constant 0 : index
    %1 = vector.load %arg2[%c0_1, %c0_2] : memref<1x64xf32, #tpu.memory_space<vmem>>, vector<1x64xf32>
    %2 = vector.broadcast %1 : vector<1x64xf32> to vector<8x64xf32>
    %3 = arith.mulf %0, %2 : vector<8x64xf32>
    %c0_3 = arith.constant 0 : index
    %c0_4 = arith.constant 0 : index
    %4 = vector.load %arg3[%c0_3, %c0_4] : memref<8x64xf32, #tpu.memory_space<vmem>>, vector<8x64xf32>
    tpu.vector_store %arg3[%c0_3, %c0_4], %3 {strides = array<i32>} : memref<8x64xf32, #tpu.memory_space<vmem>>, vector<8x64xf32>,
    return
  }
  func.func @transform_0(%arg0: i32) -> (i32, i32) {
    %c0_i32 = arith.constant 0 : i32
    %c0_i32_0 = arith.constant 0 : i32
    return %arg0, %c0_i32 : i32, i32
  }
  func.func @transform_1(%arg0: i32) -> (i32, i32) {
    %c0_i32 = arith.constant 0 : i32
    %c0_i32_0 = arith.constant 0 : i32
    %c0_i32_1 = arith.constant 0 : i32
    return %c0_i32, %c0_i32_0 : i32, i32
  }
  func.func @transform_2(%arg0: i32) -> (i32, i32) {
    %c0_i32 = arith.constant 0 : i32
    %c0_i32_0 = arith.constant 0 : i32
    return %arg0, %c0_i32 : i32, i32
  }
}

</mosaic_0001>

<bundles_post_ra>
// kernel: tpu_custom_call.1
= control target key start
LH: loop header
LB: loop body
LE: loop exit
PB: predicated region body
PF: predicated region fallthrough
CT: control target
= control target key end

     0   :  { %7 = vsyncpa [#allocation3], 0  ;;  %s123_s0 = inlined_call_operand.hbm [shape: f32[8,64], index: 0, kind: input, shape index: {}]   ;;  %s124_s1 = inlined_call_operand.vmem [shape: f32[1,64], index: 1, kind: input, shape index: {}]   ;;  %s125_s2 = inlined_call_operand.hbm [shape: f32[8,64], index: 2, kind: output, shape index: {}]  }
   0x1   :  { %8 = vsyncpa [#allocation4], 0  ;;  %s97_s9 = smov [#allocation2]  }
   0x2   :  { %s15_s10 = sshll.u32 %s97_s9, 4  ;;  %s16_s10 = int_to_ptr.vmem [resolvable:$true] %s15_s10 }
   0x3   :  { %s61_s11 = scalar_lea.vmem %s16_s10, 128  ;;  %p66_p1 = scmp.lt.s32.totalorder %s16_s10, %s16_s10 }
   0x4   :  { %p62_p0 = scmp.ne.s32.totalorder %s16_s10, %s61_s11  ;;  %p67_p2 = scmp.lt.s32.totalorder %s61_s11, %s61_s11 }
   0x6   :  { %p68_p3 = por %p67_p2, %p66_p1 }
   0x8   :  { %p69_p4 = pnand %p68_p3, %p62_p0 }
   0xa   :  { %72 = shalt.err (!%p69_p4)
}
   0xb   :  { %18 = dma.hbm_to_vmem [thread:$0]  %s123_s0, 128, %s16_s10, [#allocation3]  }
   0xc   :  { %93 = dma.done.wait [#allocation3], 128  }
   0xd   :  { %94 = vsyncadd [#allocation3], 4294967168  ;;  %s98_s14 = smov [#allocation5]   ;;  %v24_v0 = vld [vmem:[#allocation2] sm:$0xff]  ;;  %vm33_vm0 = vcmask 523264  }
   0xe   :  { %s41_s15 = sshll.u32 %s98_s14, 4  ;;  %v50_v1 = vld [vmem:[%s124_s1] ss:$0 sm:$0xff]  ;;  %s42_s15 = int_to_ptr.vmem [resolvable:$true] %s41_s15 }
   0xf   :  { %v32_v2 = vmul.f32 %v50_v1, %v24_v0  ;;  %s73_s18 = scalar_lea.vmem %s42_s15, 128  ;;  %p78_p6 = scmp.lt.s32.totalorder %s42_s15, %s42_s15 }
  0x10   :  { %p74_p5 = scmp.ne.s32.totalorder %s42_s15, %s73_s18  ;;  %p79_p7 = scmp.lt.s32.totalorder %s73_s18, %s73_s18 }
  0x11   :  { %34 = vst.msk [vmem:[#allocation5] sm:$0xff] %vm33_vm0, %v32_v2 }
  0x12   :  { %p80_p8 = por %p79_p7, %p78_p6 }
  0x14   :  { %p81_p9 = pnand %p80_p8, %p74_p5 }
  0x16   :  { %84 = shalt.err (!%p81_p9)
}
  0x17   :  { %44 = dma.vmem_to_hbm [thread:$0]  %s42_s15, 128, %s125_s2, [#allocation4]  }
  0x18   :  { %95 = dma.done.wait [#allocation4], 128  }
  0x19   :  { %96 = vsyncadd [#allocation4], 4294967168 }
  0x1a   :  { %48 = vsyncpa [#allocation3], 1 }
  0x1b   :  { %49 = vsyncpa [#allocation4], 1 }

</bundles_post_ra>
